<compile_context>
chip_gen: v7x
topology: tpu7x:2x2x1
jax: 0.10.0
libtpu: 0.0.40
codegen_flags: <defaults>
</compile_context>

<pallas_src>
import jax
import jax.numpy as jnp
from jax.experimental import pallas as pl
from jax.experimental.pallas import tpu as pltpu

INPUT_SIZE = 4
OUTPUT_SIZE = 3
LANE = 128  # batch tiles are multiples of the 128-lane width


# ---------------------------------------------------------------------------
# VMEM budget / tile sizing (computed once at import time, per generation).
#
# Real per-grid-step footprint: the (4, tb) input tile and (3, tb) output tile
# each sublane-pad to 8 rows in VMEM -> 32*tb bytes per buffer; with input and
# output both double-buffered the pipeline needs ~128*tb bytes.
# ---------------------------------------------------------------------------
def _vmem_capacity_bytes():
    try:
        return int(pltpu.get_tpu_info().vmem_capacity_bytes)
    except Exception:
        return 64 << 20  # conservative fallback: v7x per-TensorCore VMEM


_VMEM_CAP = _vmem_capacity_bytes()
# Scoped-VMEM limit we request (<= 3/4 of physical, clamped to sane bounds).
_VMEM_LIMIT = max(32 << 20, min((_VMEM_CAP * 3) // 4, 112 << 20))
# Keep the pipeline buffers within ~half the requested limit (headroom for
# compiler scratch + the tiny weight/bias tiles).
_TILE_BUDGET = _VMEM_LIMIT // 2
_TILE_CAP = max(LANE, (_TILE_BUDGET // 128 // LANE) * LANE)  # batch elems / tile
# Above this many (lane-padded) rows we force >=2 grid steps so the "parallel"
# batch axis can actually shard across the 2 TensorCores on v7x.
_MIN_SPLIT = 32768


def _linear_kernel(w_ref, b_ref, x_ref, o_ref):
    # w_ref: (OUT, IN) f32 VMEM, resident across all batch tiles
    # b_ref: (OUT, 1)  f32 VMEM, resident
    # x_ref: (IN, TB)  streamed tile of x^T (batch on the lane axis)
    # o_ref: (OUT, TB) streamed tile of y^T (lane-dense stores)
    x = x_ref[...].astype(jnp.float32)  # (4, TB)
    w = w_ref[...]                      # (3, 4)
    acc = jnp.broadcast_to(b_ref[...], (OUTPUT_SIZE, x.shape[1]))  # (3, TB)
    for k in range(INPUT_SIZE):
        # (3,1) * (1,TB) -> (3,TB): 4 vectorized FMAs on full-width tiles
        acc = acc + w[:, k:k + 1] * x[k:k + 1, :]
    o_ref[...] = acc.astype(o_ref.dtype)


def _forward_impl(x, weight, bias):
    """y = x @ weight.T + bias.  x: (B, 4), weight: (3, 4), bias: (3,)."""
    B = x.shape[0]
    dtype = x.dtype

    # Lane-dense internal layout: batch on lanes. Under jit the transpose/pad
    # fuse with surrounding ops rather than dispatching as separate passes.
    xT = jnp.transpose(x)  # (IN, B)

    # Tile selection: lane-pad the batch, split into g roughly-equal tiles of
    # at most _TILE_CAP elements each (padding waste < g * LANE elements).
    b_lane = pl.cdiv(B, LANE) * LANE
    g = pl.cdiv(b_lane, _TILE_CAP)
    if g == 1 and b_lane >= _MIN_SPLIT:
        g = 2  # let the "parallel" axis use both TensorCores on v7x
    tb = pl.cdiv(pl.cdiv(b_lane, g), LANE) * LANE
    b_pad = g * tb
    if b_pad != B:
        xT = jnp.pad(xT, ((0, 0), (0, b_pad - B)))

    w = weight.astype(jnp.float32).reshape(OUTPUT_SIZE, INPUT_SIZE)  # (3, 4)
    b = bias.astype(jnp.float32).reshape(OUTPUT_SIZE, 1)             # (3, 1)

    itemsize = jnp.dtype(dtype).itemsize
    cost = pl.CostEstimate(
        flops=2 * b_pad * INPUT_SIZE * OUTPUT_SIZE,
        transcendentals=0,
        bytes_accessed=b_pad * (INPUT_SIZE + OUTPUT_SIZE) * itemsize
        + (INPUT_SIZE * OUTPUT_SIZE + OUTPUT_SIZE) * 4,
    )

    yT = pl.pallas_call(
        _linear_kernel,
        out_shape=jax.ShapeDtypeStruct((OUTPUT_SIZE, b_pad), dtype),
        grid_spec=pltpu.PrefetchScalarGridSpec(
            num_scalar_prefetch=0,
            grid=(g,),
            in_specs=[
                pl.BlockSpec((OUTPUT_SIZE, INPUT_SIZE), lambda i: (0, 0)),  # W (resident)
                pl.BlockSpec((OUTPUT_SIZE, 1), lambda i: (0, 0)),           # bias (resident)
                pl.BlockSpec((INPUT_SIZE, tb), lambda i: (0, i)),           # x^T (streamed)
            ],
            out_specs=pl.BlockSpec((OUTPUT_SIZE, tb), lambda i: (0, i)),    # y^T (streamed)
        ),
        compiler_params=pltpu.CompilerParams(
            dimension_semantics=("parallel",),  # batch tiles are independent
            vmem_limit_bytes=_VMEM_LIMIT,
        ),
        cost_estimate=cost,
    )(w, b, xT)

    # Back to PyTorch layout (B, 3); drop batch padding (fused under jit).
    return jnp.transpose(yT[:, :B])


ann_linear_forward = jax.jit(_forward_impl)


def init_params(key):
    """Deterministic init mimicking nn.Linear default: U(-1/sqrt(in), 1/sqrt(in))."""
    k_w, k_b = jax.random.split(key)
    bound = 1.0 / jnp.sqrt(jnp.float32(INPUT_SIZE))
    weight = jax.random.uniform(
        k_w, (OUTPUT_SIZE, INPUT_SIZE), jnp.float32, minval=-bound, maxval=bound
    )
    bias = jax.random.uniform(
        k_b, (OUTPUT_SIZE,), jnp.float32, minval=-bound, maxval=bound
    )
    return weight, bias


if __name__ == "__main__":
    key = jax.random.PRNGKey(0)
    k_params, k_x = jax.random.split(key)
    weight, bias = init_params(k_params)

    batch = 8
    x = jax.random.normal(k_x, (batch, INPUT_SIZE), jnp.float32)

    y = ann_linear_forward(x, weight, bias)
    jax.block_until_ready(y)

    # Cross-check against plain JAX reference.
    y_ref = x @ weight.T + bias
    assert y.shape == (batch, OUTPUT_SIZE)
    assert jnp.allclose(y, y_ref, atol=1e-5, rtol=1e-5)

    print("KERNEL_OK")
</pallas_src>

<mosaic_0001>
module attributes {stable_mosaic.version = 11 : i64} {
  func.func @_linear_kernel(%arg0: i32, %arg1: memref<3x4xf32, #tpu.memory_space<vmem>>, %arg2: memref<3x1xf32, #tpu.memory_space<vmem>>, %arg3: memref<4x128xf32, #tpu.memory_space<vmem>>, %arg4: memref<3x128xf32, #tpu.memory_space<vmem>>) attributes {dimension_semantics = [#tpu.dimension_semantics<parallel>], iteration_bounds = array<i64: 1>, scalar_prefetch = 0 : i64, scratch_operands = 0 : i64, tpu.core_type = #tpu.core_type<tc>, window_params = [{pipeline_mode = #tpu.pipeline_mode<synchronous>, transform_indices = @transform_0, window_bounds = array<i64: 3, 4>}, {pipeline_mode = #tpu.pipeline_mode<synchronous>, transform_indices = @transform_1, window_bounds = array<i64: 3, 1>}, {transform_indices = @transform_2, window_bounds = array<i64: 4, 128>}, {transform_indices = @transform_3, window_bounds = array<i64: 3, 128>}]} {
    %c0 = arith.constant 0 : index
    %c0_0 = arith.constant 0 : index
    %0 = vector.load %arg3[%c0, %c0_0] : memref<4x128xf32, #tpu.memory_space<vmem>>, vector<4x128xf32>
    %c0_1 = arith.constant 0 : index
    %c0_2 = arith.constant 0 : index
    %1 = vector.load %arg1[%c0_1, %c0_2] : memref<3x4xf32, #tpu.memory_space<vmem>>, vector<3x4xf32>
    %c0_3 = arith.constant 0 : index
    %c0_4 = arith.constant 0 : index
    %2 = vector.load %arg2[%c0_3, %c0_4] : memref<3x1xf32, #tpu.memory_space<vmem>>, vector<3x1xf32>
    %3 = vector.shape_cast %2 : vector<3x1xf32> to vector<3x1xf32>
    %4 = vector.broadcast %3 : vector<3x1xf32> to vector<3x128xf32>
    %5 = vector.extract_strided_slice %1 {offsets = [0, 0], sizes = [3, 1], strides = [1, 1]} : vector<3x4xf32> to vector<3x1xf32>
    %6 = vector.extract_strided_slice %0 {offsets = [0, 0], sizes = [1, 128], strides = [1, 1]} : vector<4x128xf32> to vector<1x128xf32>
    %7 = vector.broadcast %5 : vector<3x1xf32> to vector<3x128xf32>
    %8 = vector.broadcast %6 : vector<1x128xf32> to vector<3x128xf32>
    %9 = arith.mulf %7, %8 : vector<3x128xf32>
    %10 = arith.addf %4, %9 : vector<3x128xf32>
    %11 = vector.extract_strided_slice %1 {offsets = [0, 1], sizes = [3, 1], strides = [1, 1]} : vector<3x4xf32> to vector<3x1xf32>
    %12 = vector.extract_strided_slice %0 {offsets = [1, 0], sizes = [1, 128], strides = [1, 1]} : vector<4x128xf32> to vector<1x128xf32>
    %13 = vector.broadcast %11 : vector<3x1xf32> to vector<3x128xf32>
    %14 = vector.broadcast %12 : vector<1x128xf32> to vector<3x128xf32>
    %15 = arith.mulf %13, %14 : vector<3x128xf32>
    %16 = arith.addf %10, %15 : vector<3x128xf32>
    %17 = vector.extract_strided_slice %1 {offsets = [0, 2], sizes = [3, 1], strides = [1, 1]} : vector<3x4xf32> to vector<3x1xf32>
    %18 = vector.extract_strided_slice %0 {offsets = [2, 0], sizes = [1, 128], strides = [1, 1]} : vector<4x128xf32> to vector<1x128xf32>
    %19 = vector.broadcast %17 : vector<3x1xf32> to vector<3x128xf32>
    %20 = vector.broadcast %18 : vector<1x128xf32> to vector<3x128xf32>
    %21 = arith.mulf %19, %20 : vector<3x128xf32>
    %22 = arith.addf %16, %21 : vector<3x128xf32>
    %23 = vector.extract_strided_slice %1 {offsets = [0, 3], sizes = [3, 1], strides = [1, 1]} : vector<3x4xf32> to vector<3x1xf32>
    %24 = vector.extract_strided_slice %0 {offsets = [3, 0], sizes = [1, 128], strides = [1, 1]} : vector<4x128xf32> to vector<1x128xf32>
    %25 = vector.broadcast %23 : vector<3x1xf32> to vector<3x128xf32>
    %26 = vector.broadcast %24 : vector<1x128xf32> to vector<3x128xf32>
    %27 = arith.mulf %25, %26 : vector<3x128xf32>
    %28 = arith.addf %22, %27 : vector<3x128xf32>
    %c0_5 = arith.constant 0 : index
    %c0_6 = arith.constant 0 : index
    %29 = vector.load %arg4[%c0_5, %c0_6] : memref<3x128xf32, #tpu.memory_space<vmem>>, vector<3x128xf32>
    tpu.vector_store %arg4[%c0_5, %c0_6], %28 {strides = array<i32>} : memref<3x128xf32, #tpu.memory_space<vmem>>, vector<3x128xf32>,
    return
  }
  func.func @transform_0(%arg0: i32) -> (i32, i32) {
    %c0_i32 = arith.constant 0 : i32
    %c0_i32_0 = arith.constant 0 : i32
    %c0_i32_1 = arith.constant 0 : i32
    return %c0_i32, %c0_i32_0 : i32, i32
  }
  func.func @transform_1(%arg0: i32) -> (i32, i32) {
    %c0_i32 = arith.constant 0 : i32
    %c0_i32_0 = arith.constant 0 : i32
    %c0_i32_1 = arith.constant 0 : i32
    return %c0_i32, %c0_i32_0 : i32, i32
  }
  func.func @transform_2(%arg0: i32) -> (i32, i32) {
    %c0_i32 = arith.constant 0 : i32
    %c0_i32_0 = arith.constant 0 : i32
    return %c0_i32, %arg0 : i32, i32
  }
  func.func @transform_3(%arg0: i32) -> (i32, i32) {
    %c0_i32 = arith.constant 0 : i32
    %c0_i32_0 = arith.constant 0 : i32
    return %c0_i32, %arg0 : i32, i32
  }
}

</mosaic_0001>

<bundles_post_ra>
// kernel: _forward_impl.1
= control target key start
LH: loop header
LB: loop body
LE: loop exit
PB: predicated region body
PF: predicated region fallthrough
CT: control target
= control target key end

     0   :  { %v76_v0 = vmov 0   ;;  %v77_v1 = vmov 1   ;;  %v78_v4 = vmov 2   ;;  %v79_v5 = vmov 3   ;;  %s112_s0 = inlined_call_operand.vmem [shape: f32[3,4], index: 0, kind: input, shape index: {}]   ;;  %s113_s1 = inlined_call_operand.vmem [shape: f32[3,1], index: 1, kind: input, shape index: {}]   ;;  %s114_s2 = inlined_call_operand.vmem [shape: f32[4,128], index: 2, kind: input, shape index: {}]   ;;  %s115_s3 = inlined_call_operand.vmem [shape: f32[3,128], index: 3, kind: output, shape index: {}]  }
   0x1   :  { %72 = vset.pattern.permute.xlu0 %v76_v0  ;;  %73 = vset.pattern.permute.xlu1 %v77_v1  ;;  %v15_v2 = vld [vmem:[%s112_s0] sm:$0x7]  ;;  %v27_v6 = vlaneseq }
   0x2   :  { %24 = vperm.xlu0 %72, %v15_v2   ;;  %34 = vperm.xlu1 %73, %v15_v2   ;;  %v16_v3 = vld [vmem:[%s113_s1] sm:$0x7] }
   0x3   :  { %v28_v7 = vshrl.u32 %v27_v6, 7  ;;  %v14_v9 = vld [vmem:[%s114_s2] sm:$0xf] }
   0x5   :  { %v29_v8 = vsub.s32 0, %v28_v7  ;;  %v39_v10 = vsub.s32 1, %v28_v7  ;;  %v49_v11 = vsub.s32 2, %v28_v7  ;;  %v59_v17 = vsub.s32 3, %v28_v7 }
   0x6   :  { %19 = vperm.xlu0 %72, %v16_v3   ;;  %74 = vset.pattern.permute.xlu1 %v78_v4 }
   0x7   :  { %44 = vperm.xlu1 %74, %v15_v2   ;;  %v30_v12 = vrot.slane %v14_v9, %v29_v8  ;;  %v40_v15 = vrot.slane %v14_v9, %v39_v10  ;;  %v50_v16 = vrot.slane %v14_v9, %v49_v11  ;;  %v60_v24 = vrot.slane %v14_v9, %v59_v17 }
   0xa   :  { %75 = vset.pattern.permute.xlu0 %v79_v5 }
   0xb   :  { %54 = vperm.xlu0 %75, %v15_v2  }
  0x81   :  { %v25_v13 = vpop.permute.xlu0 %24  ;;  %v35_v14 = vpop.permute.xlu1 %34 }
  0x82   :  { %v31_v18 = vmul.f32 %v30_v12, %v25_v13  ;;  %v41_v20 = vmul.f32 %v40_v15, %v35_v14 }
  0x85   :  { %v20_v19 = vpop.permute.xlu0 %19 }
  0x86   :  { %v32_v21 = vadd.f32 %v31_v18, %v20_v19  ;;  %v45_v22 = vpop.permute.xlu1 %44 }
  0x87   :  { %v51_v23 = vmul.f32 %v50_v16, %v45_v22 }
  0x88   :  { %v42_v25 = vadd.f32 %v41_v20, %v32_v21 }
  0x8a   :  { %v52_v26 = vadd.f32 %v51_v23, %v42_v25  ;;  %v55_v27 = vpop.permute.xlu0 %54 }
  0x8b   :  { %v61_v28 = vmul.f32 %v60_v24, %v55_v27 }
  0x8d   :  { %v62_v29 = vadd.f32 %v61_v28, %v52_v26 }
  0x8f   :  { %63 = vst [vmem:[%s115_s3] sm:$0x7] %v62_v29 }

</bundles_post_ra>
